<compile_context>
chip_gen: v7x
topology: tpu7x:2x2x1
jax: 0.10.0
libtpu: 0.0.40
codegen_flags: <defaults>
</compile_context>

<pallas_src>
import functools

import jax
import jax.numpy as jnp
from jax.experimental import pallas as pl
from jax.experimental.pallas import tpu as pltpu

_LANE = 128
_LANE_WIDTHS = (8192, 4096, 2048, 1024, 512, 256, 128)   # widest first
_VMEM_LIMIT_BYTES = 40 * 1024 * 1024    # explicit scoped-VMEM budget (all gens)
_TILE_BYTES_MAX = 12 * 1024 * 1024      # never let a single tile exceed this


def _device_kind():
    try:
        return jax.devices()[0].device_kind.lower()
    except Exception:
        return ""


def _tile_bytes_target():
    # v7x: 8 MiB tiles (x4 double-buffered = 32 MiB) fit its 64 MiB VMEM and
    # cut per-step overhead to ~7-13%.  Other generations: 4 MiB is plenty.
    return 8 * 1024 * 1024 if "v7" in _device_kind() else 4 * 1024 * 1024


def _grid_semantics(grid_len):
    # Only CORE_PARALLEL reliably shards a grid axis across v7x's two
    # TensorCores; keep plain "parallel" everywhere else (1 TC/chip).
    if grid_len >= 2 and "v7" in _device_kind() and hasattr(pltpu, "CORE_PARALLEL"):
        return (pltpu.CORE_PARALLEL,)
    return ("parallel",)


def _choose_width(n_elems):
    """Widest lane-dense (multiple of 128) last dim that divides the flat size."""
    for w in _LANE_WIDTHS:
        if n_elems % w == 0:
            return w
    return None


def _ragged_width(shape):
    """Trailing-dims product (<= ~4096) usable as the lane dim via a zero-copy reshape."""
    width = 1
    for d in reversed(shape):
        if width == 1:
            width = d                 # always take the last dim
        elif width * d <= 4096:
            width *= d
        else:
            break
    return width


def _sublane_packing(itemsize):
    # f32 -> 8 rows/vreg, bf16 -> 16, int8/fp8 -> 32.
    return 8 * max(1, 4 // itemsize)


def _clip_kernel(x_ref, o_ref, *, min_val, max_val):
    # Pure VPU clamp on the current VMEM tile.  min_val/max_val are Python
    # scalars of the right kind (float for float dtypes, int for int dtypes),
    # so weak-type promotion keeps the tensor dtype.
    x = x_ref[...]
    o_ref[...] = jnp.minimum(jnp.maximum(x, min_val), max_val)


def _clip_slab(slab, min_val, max_val, *, donate_input=False):
    """Tiled Pallas clip on a 2-D slab (rows, width)."""
    rows, width = slab.shape
    itemsize = jnp.dtype(slab.dtype).itemsize
    packing = _sublane_packing(itemsize)

    tile_rows = (_tile_bytes_target() // (width * itemsize)) // packing * packing
    tile_rows = max(packing, tile_rows)
    tile_rows = min(tile_rows, rows)          # full-extent rows is always legal
    grid_len = pl.cdiv(rows, tile_rows)

    kernel = functools.partial(_clip_kernel, min_val=min_val, max_val=max_val)

    n_bytes = rows * width * itemsize
    extra = {"input_output_aliases": {0: 0}} if donate_input else {}

    return pl.pallas_call(
        kernel,
        out_shape=jax.ShapeDtypeStruct((rows, width), slab.dtype),
        grid_spec=pltpu.PrefetchScalarGridSpec(
            num_scalar_prefetch=0,
            grid=(grid_len,),
            in_specs=[pl.BlockSpec((tile_rows, width), lambda i: (i, 0))],
            out_specs=pl.BlockSpec((tile_rows, width), lambda i: (i, 0)),
        ),
        compiler_params=pltpu.CompilerParams(
            dimension_semantics=_grid_semantics(grid_len),
            vmem_limit_bytes=_VMEM_LIMIT_BYTES,
        ),
        cost_estimate=pl.CostEstimate(
            flops=2 * rows * width,          # min + max per element
            transcendentals=0,
            bytes_accessed=2 * n_bytes,      # read + write (bandwidth bound)
        ),
        **extra,
    )(slab)


def clip_pallas(img, min_val=0.0, max_val=1.0, *, donate_input=False):
    """Equivalent of torch.clip(img, min_val, max_val) for any-shaped array."""
    orig_shape = img.shape
    n_elems = img.size
    if n_elems == 0:
        return img

    dtype = img.dtype
    if jnp.issubdtype(dtype, jnp.floating):
        lo, hi = float(min_val), float(max_val)
    elif jnp.issubdtype(dtype, jnp.integer):
        lo, hi = int(min_val), int(max_val)      # keep int tensors int
    else:
        return jnp.clip(img, min_val, max_val)   # bool / exotic dtypes

    itemsize = jnp.dtype(dtype).itemsize

    width = _choose_width(n_elems)
    if width is not None:
        # Common case (NCHW image sizes): lane-dense zero-copy reshape,
        # unmasked full-width stores.
        slab = img.reshape(n_elems // width, width)
    elif img.ndim >= 2:
        # Ragged total size: keep a full trailing-dims extent as the lane dim
        # (still a zero-copy reshape).  Boundary tiles are masked by Pallas;
        # no concatenate / extra HBM pass.
        width = _ragged_width(orig_shape)
        slab = img.reshape(n_elems // width, width)
    else:
        # Degenerate ragged 1-D input — XLA handles it fine.
        return jnp.clip(img, lo, hi)

    rows = slab.shape[0]
    packing = _sublane_packing(itemsize)
    if min(rows, packing) * width * itemsize > _TILE_BYTES_MAX:
        # A single minimal tile would not fit the VMEM budget (huge last dim).
        return jnp.clip(img, lo, hi)

    out = _clip_slab(slab, lo, hi, donate_input=donate_input)
    return out.reshape(orig_shape)


if __name__ == "__main__":
    key = jax.random.PRNGKey(0)
    k1, k2, k3 = jax.random.split(key, 3)

    # 1) Lane-dense f32 NCHW image (2*4*16*16 = 2048 elems, multiple of 128);
    #    values in [-2, 3] so the clip actually bites.
    x = jax.random.uniform(k1, (2, 4, 16, 16), jnp.float32, minval=-2.0, maxval=3.0)
    y = clip_pallas(x, 0.0, 1.0)
    jax.block_until_ready(y)
    assert y.shape == x.shape and y.dtype == x.dtype
    assert jnp.array_equal(y, jnp.clip(x, 0.0, 1.0))

    # 2) Ragged size (2*3*7*5 = 210, not a multiple of 128): single pallas_call,
    #    masked boundary tile, no concatenate.
    x2 = jax.random.uniform(k2, (2, 3, 7, 5), jnp.float32, minval=-2.0, maxval=3.0)
    y2 = clip_pallas(x2, 0.0, 1.0)
    jax.block_until_ready(y2)
    assert jnp.array_equal(y2, jnp.clip(x2, 0.0, 1.0))

    # 3) bf16 (exercises 16-row sublane packing).
    xb = x.astype(jnp.bfloat16)
    yb = clip_pallas(xb, 0.0, 1.0)
    jax.block_until_ready(yb)
    assert yb.dtype == jnp.bfloat16
    assert jnp.array_equal(yb, jnp.clip(xb, 0.0, 1.0))

    # 4) int32 (dtype-safe bounds: stays integer, no float promotion).
    xi = jax.random.randint(k3, (2, 4, 16, 16), -5, 6, dtype=jnp.int32)
    yi = clip_pallas(xi, 0.0, 1.0)
    jax.block_until_ready(yi)
    assert yi.dtype == jnp.int32
    assert jnp.array_equal(yi, jnp.clip(xi, 0, 1))

    print("KERNEL_OK")
</pallas_src>

<mosaic_0001>
module attributes {stable_mosaic.version = 11 : i64} {
  func.func @_clip_kernel(%arg0: i32, %arg1: memref<1x2048xf32, #tpu.memory_space<vmem>>, %arg2: memref<1x2048xf32, #tpu.memory_space<vmem>>) attributes {dimension_semantics = [#tpu.dimension_semantics<parallel>], iteration_bounds = array<i64: 1>, scalar_prefetch = 0 : i64, scratch_operands = 0 : i64, tpu.core_type = #tpu.core_type<tc>, window_params = [{transform_indices = @transform_0, window_bounds = array<i64: 1, 2048>}, {transform_indices = @transform_1, window_bounds = array<i64: 1, 2048>}]} {
    %c0 = arith.constant 0 : index
    %c0_0 = arith.constant 0 : index
    %0 = vector.load %arg1[%c0, %c0_0] : memref<1x2048xf32, #tpu.memory_space<vmem>>, vector<1x2048xf32>
    %cst = arith.constant 0.000000e+00 : f32
    %1 = vector.broadcast %cst : f32 to vector<1x2048xf32>
    %2 = arith.maximumf %0, %1 : vector<1x2048xf32>
    %cst_1 = arith.constant 1.000000e+00 : f32
    %3 = vector.broadcast %cst_1 : f32 to vector<1x2048xf32>
    %4 = arith.minimumf %2, %3 : vector<1x2048xf32>
    %c0_2 = arith.constant 0 : index
    %c0_3 = arith.constant 0 : index
    %5 = vector.load %arg2[%c0_2, %c0_3] : memref<1x2048xf32, #tpu.memory_space<vmem>>, vector<1x2048xf32>
    tpu.vector_store %arg2[%c0_2, %c0_3], %4 {strides = array<i32>} : memref<1x2048xf32, #tpu.memory_space<vmem>>, vector<1x2048xf32>,
    return
  }
  func.func @transform_0(%arg0: i32) -> (i32, i32) {
    %c0_i32 = arith.constant 0 : i32
    %c0_i32_0 = arith.constant 0 : i32
    return %arg0, %c0_i32 : i32, i32
  }
  func.func @transform_1(%arg0: i32) -> (i32, i32) {
    %c0_i32 = arith.constant 0 : i32
    %c0_i32_0 = arith.constant 0 : i32
    return %arg0, %c0_i32 : i32, i32
  }
}

</mosaic_0001>

<bundles_post_ra>
// kernel: tpu_custom_call.1
= control target key start
LH: loop header
LB: loop body
LE: loop exit
PB: predicated region body
PF: predicated region fallthrough
CT: control target
= control target key end

     0   :  { %6 = vsyncpa [#allocation3], 0  ;;  %s130_s0 = inlined_call_operand.hbm [shape: f32[1,2048], index: 0, kind: input, shape index: {}]   ;;  %s131_s1 = inlined_call_operand.hbm [shape: f32[1,2048], index: 1, kind: output, shape index: {}]  }
   0x1   :  { %7 = vsyncpa [#allocation4], 0  ;;  %s94_s6 = smov [#allocation2]   ;;  %s46_s10 = scalar_lea.hbm %s130_s0, 256 }
   0x2   :  { %s14_s7 = sshll.u32 %s94_s6, 4  ;;  %p47_p0 = scmp.ne.s32.totalorder %s130_s0, %s46_s10  ;;  %s15_s7 = int_to_ptr.vmem [resolvable:$true] %s14_s7 }
   0x3   :  { %p50_p1 = scmp.lt.u32.totalorder %s46_s10, %s130_s0 }
   0x5   :  { %p52_p2 = pnand %p50_p1, %p47_p0 }
   0x7   :  { %55 = shalt.err (!%p52_p2)
}
   0x8   :  { %s56_s15 = scalar_lea.vmem %s15_s7, 256  ;;  %p61_p4 = scmp.lt.s32.totalorder %s15_s7, %s15_s7 }
   0x9   :  { %p57_p3 = scmp.ne.s32.totalorder %s15_s7, %s56_s15  ;;  %p62_p5 = scmp.lt.s32.totalorder %s56_s15, %s56_s15 }
   0xb   :  { %p63_p6 = por %p62_p5, %p61_p4 }
   0xd   :  { %p64_p7 = pnand %p63_p6, %p57_p3 }
   0xf   :  { %67 = shalt.err (!%p64_p7)
}
  0x10   :  { %17 = dma.hbm_to_vmem [thread:$0]  %s130_s0, 256, %s15_s7, [#allocation3]  }
  0x11   :  { %90 = dma.done.wait [#allocation3], 256  }
  0x12   :  { %91 = vsyncadd [#allocation3], 4294967040  ;;  %v21_v0 = vld [vmem:[#allocation2] sm:$0xff]  ;;  %v22_v1 = vld [vmem:[#allocation2 + $0x8] sm:$0xff]  ;;  %s95_s18 = smov [#allocation5]  }
  0x13   :  { %s35_s19 = sshll.u32 %s95_s18, 4  ;;  %v23_v2 = vmax.f32 %v21_v0, 0.0  ;;  %v24_v3 = vmax.f32 %v22_v1, 0.0  ;;  %s36_s19 = int_to_ptr.vmem [resolvable:$true] %s35_s19 }
  0x14   :  { %s68_s20 = scalar_lea.vmem %s36_s19, 256  ;;  %p73_p9 = scmp.lt.s32.totalorder %s36_s19, %s36_s19 }
  0x15   :  { %v25_v4 = vmin.f32 %v23_v2, 1.0  ;;  %v26_v5 = vmin.f32 %v24_v3, 1.0  ;;  %p69_p8 = scmp.ne.s32.totalorder %s36_s19, %s68_s20  ;;  %p74_p10 = scmp.lt.s32.totalorder %s68_s20, %s68_s20 }
  0x17   :  { %27 = vst [vmem:[#allocation5] sm:$0xff] %v25_v4  ;;  %28 = vst [vmem:[#allocation5 + $0x8] sm:$0xff] %v26_v5  ;;  %p75_p11 = por %p74_p10, %p73_p9 }
  0x19   :  { %p76_p12 = pnand %p75_p11, %p69_p8 }
  0x1b   :  { %79 = shalt.err (!%p76_p12)
}
  0x1c   :  { %s80_s22 = scalar_lea.hbm %s131_s1, 256 }
  0x1d   :  { %p81_p13 = scmp.ne.s32.totalorder %s131_s1, %s80_s22  ;;  %p84_p0 = scmp.lt.u32.totalorder %s80_s22, %s131_s1 }
  0x1f   :  { %p86_p1 = pnand %p84_p0, %p81_p13 }
  0x21   :  { %89 = shalt.err (!%p86_p1)
}
  0x22   :  { %38 = dma.vmem_to_hbm [thread:$0]  %s36_s19, 256, %s131_s1, [#allocation4]  }
  0x23   :  { %92 = dma.done.wait [#allocation4], 256  }
  0x24   :  { %93 = vsyncadd [#allocation4], 4294967040 }
  0x25   :  { %42 = vsyncpa [#allocation3], 1 }
  0x26   :  { %43 = vsyncpa [#allocation4], 1 }

</bundles_post_ra>
